<compile_context>
chip_gen: v5e
topology: v5e:2x2
jax: 0.10.0
libtpu: 0.0.40
codegen_flags: <defaults>
</compile_context>

<pallas_src>
import jax
import jax.numpy as jnp
from jax.experimental import pallas as pl
from jax.experimental.pallas import tpu as pltpu


def _pick_tile(P, candidates=(512, 256, 128)):
    for t in candidates:
        if P % t == 0:
            return t
    return P


# --------------------------------------------------------------------------
# Kernel 1: Jaccard overlap (IoU) between padded GT boxes and prior boxes.
# --------------------------------------------------------------------------
def _iou_kernel(boxes_ref, priors_ref, o_ref):
    # boxes_ref : (1, M, 4)  xy boxes for one image (padded objects are zeros)
    # priors_ref: (4, TP)    xy priors, coords on sublanes, priors on lanes
    # o_ref     : (1, M, TP) IoU
    b = boxes_ref[0]                                   # (M, 4)
    bx1 = b[:, 0:1]; by1 = b[:, 1:2]                   # (M, 1)
    bx2 = b[:, 2:3]; by2 = b[:, 3:4]
    px1 = priors_ref[0:1, :]; py1 = priors_ref[1:2, :]  # (1, TP)
    px2 = priors_ref[2:3, :]; py2 = priors_ref[3:4, :]

    iw = jnp.maximum(jnp.minimum(bx2, px2) - jnp.maximum(bx1, px1), 0.0)
    ih = jnp.maximum(jnp.minimum(by2, py2) - jnp.maximum(by1, py1), 0.0)
    inter = iw * ih                                     # (M, TP)
    area_b = (bx2 - bx1) * (by2 - by1)                  # (M, 1)
    area_p = (px2 - px1) * (py2 - py1)                  # (1, TP)
    union = area_b + area_p - inter                     # >= area_p > 0
    o_ref[0] = inter / union


def jaccard_overlap_pallas(boxes_xy, priors_xy_t):
    """boxes_xy: (N, M, 4), priors_xy_t: (4, P) -> overlap (N, M, P)."""
    N, M, _ = boxes_xy.shape
    _, P = priors_xy_t.shape
    TP = _pick_tile(P)
    return pl.pallas_call(
        _iou_kernel,
        out_shape=jax.ShapeDtypeStruct((N, M, P), jnp.float32),
        grid=(N, P // TP),
        in_specs=[
            pl.BlockSpec((1, M, 4), lambda n, t: (n, 0, 0)),
            pl.BlockSpec((4, TP), lambda n, t: (0, t)),
        ],
        out_specs=pl.BlockSpec((1, M, TP), lambda n, t: (n, 0, t)),
        compiler_params=pltpu.CompilerParams(
            dimension_semantics=("parallel", "parallel")),
    )(boxes_xy, priors_xy_t)


# --------------------------------------------------------------------------
# Kernel 2: fused per-prior cross-entropy + gcxgcy encoding + masked L1.
# --------------------------------------------------------------------------
def _loss_terms_kernel(scores_ref, labels_ref, ploc_ref, mbox_ref, prior_ref,
                       ce_ref, l1_ref):
    # scores_ref: (1, C, TP)   class logits, classes on sublanes
    # labels_ref: (1, 1, TP)   matched class per prior (int32)
    # ploc_ref  : (1, 4, TP)   predicted offsets (gcxgcy)
    # mbox_ref  : (1, 4, TP)   matched GT box per prior, xy coords
    # prior_ref : (4, TP)      priors in cxcy
    # ce_ref    : (1, 1, TP)   cross-entropy per prior
    # l1_ref    : (1, 1, TP)   positive-masked L1 localization term per prior
    s = scores_ref[0]                                   # (C, TP)
    lab = labels_ref[0]                                 # (1, TP) int32

    # numerically stable cross-entropy: logsumexp(s) - s[true]
    m = jnp.max(s, axis=0, keepdims=True)               # (1, TP)
    lse = m + jnp.log(jnp.sum(jnp.exp(s - m), axis=0, keepdims=True))
    cls_iota = jax.lax.broadcasted_iota(jnp.int32, s.shape, 0)   # (C, TP)
    onehot = (cls_iota == lab).astype(jnp.float32)
    true_score = jnp.sum(s * onehot, axis=0, keepdims=True)      # (1, TP)
    ce_ref[0] = lse - true_score

    # matched xy box -> cxcy -> gcxgcy offsets w.r.t. priors
    mb = mbox_ref[0]                                    # (4, TP)
    x1 = mb[0:1]; y1 = mb[1:2]; x2 = mb[2:3]; y2 = mb[3:4]
    cx = (x1 + x2) * 0.5
    cy = (y1 + y2) * 0.5
    w = x2 - x1
    h = y2 - y1
    pcx = prior_ref[0:1]; pcy = prior_ref[1:2]
    pw = prior_ref[2:3]; ph = prior_ref[3:4]
    gcx = (cx - pcx) / (pw / 10.0)
    gcy = (cy - pcy) / (ph / 10.0)
    gw = jnp.log(w / pw) * 5.0
    gh = jnp.log(h / ph) * 5.0

    pd = ploc_ref[0]                                    # (4, TP)
    l1 = (jnp.abs(pd[0:1] - gcx) + jnp.abs(pd[1:2] - gcy)
          + jnp.abs(pd[2:3] - gw) + jnp.abs(pd[3:4] - gh))       # (1, TP)
    pos = lab != 0
    l1_ref[0] = jnp.where(pos, l1, 0.0)


def loss_terms_pallas(scores_t, true_classes, pred_locs_t, matched_t,
                      priors_cxcy_t):
    """Returns (conf_loss_all (N,P), masked loc L1 per prior (N,P))."""
    N, C, P = scores_t.shape
    TP = _pick_tile(P)
    labels3 = true_classes.reshape(N, 1, P).astype(jnp.int32)
    ce, l1 = pl.pallas_call(
        _loss_terms_kernel,
        out_shape=(jax.ShapeDtypeStruct((N, 1, P), jnp.float32),
                   jax.ShapeDtypeStruct((N, 1, P), jnp.float32)),
        grid=(N, P // TP),
        in_specs=[
            pl.BlockSpec((1, C, TP), lambda n, t: (n, 0, t)),
            pl.BlockSpec((1, 1, TP), lambda n, t: (n, 0, t)),
            pl.BlockSpec((1, 4, TP), lambda n, t: (n, 0, t)),
            pl.BlockSpec((1, 4, TP), lambda n, t: (n, 0, t)),
            pl.BlockSpec((4, TP), lambda n, t: (0, t)),
        ],
        out_specs=(
            pl.BlockSpec((1, 1, TP), lambda n, t: (n, 0, t)),
            pl.BlockSpec((1, 1, TP), lambda n, t: (n, 0, t)),
        ),
        compiler_params=pltpu.CompilerParams(
            dimension_semantics=("parallel", "parallel")),
    )(scores_t, labels3, pred_locs_t, matched_t, priors_cxcy_t)
    return ce.reshape(N, P), l1.reshape(N, P)


# --------------------------------------------------------------------------
# MultiBoxLoss module
# --------------------------------------------------------------------------
def cxcy_to_xy(cxcy):
    return jnp.concatenate([cxcy[:, :2] - cxcy[:, 2:] / 2.0,
                            cxcy[:, :2] + cxcy[:, 2:] / 2.0], axis=1)


class MultiBoxLossPallas:
    """MultiBox loss. Ground-truth boxes/labels are passed padded to a fixed
    max number of objects per image together with a validity mask (JAX needs
    static shapes — this replaces the PyTorch list-of-tensors input)."""

    def __init__(self, priors_cxcy, threshold=0.5, neg_pos_ratio=3, alpha=1.0):
        self.priors_cxcy = priors_cxcy                    # (P, 4)
        self.priors_xy = cxcy_to_xy(priors_cxcy)          # (P, 4)
        self.threshold = threshold
        self.neg_pos_ratio = neg_pos_ratio
        self.alpha = alpha
        # transposed (4, P) copies: lane-dense layout for the kernels
        self.priors_xy_t = jnp.transpose(self.priors_xy)
        self.priors_cxcy_t = jnp.transpose(self.priors_cxcy)

    # ---- per-image matching (small dynamic-index work, plain JAX) ----------
    def _match(self, overlap, boxes_xy, labels, obj_valid):
        N, M, P = overlap.shape
        ov = jnp.where(obj_valid[:, :, None], overlap, -1.0)
        overlap_for_each_prior = jnp.max(ov, axis=1)          # (N, P)
        object_for_each_prior = jnp.argmax(ov, axis=1)        # (N, P)
        prior_for_each_object = jnp.argmax(ov, axis=2)        # (N, M)

        obj_ids = jnp.arange(M, dtype=object_for_each_prior.dtype)
        # invalid objects scatter to an out-of-range index -> dropped
        scatter_idx = jnp.where(obj_valid, prior_for_each_object, P)

        def assign_one(ofp, ovfp, idx):
            ofp = ofp.at[idx].set(obj_ids, mode='drop')
            ovfp = ovfp.at[idx].set(1.0, mode='drop')
            return ofp, ovfp

        object_for_each_prior, overlap_for_each_prior = jax.vmap(assign_one)(
            object_for_each_prior, overlap_for_each_prior, scatter_idx)

        label_for_each_prior = jnp.take_along_axis(
            labels, object_for_each_prior, axis=1)            # (N, P)
        true_classes = jnp.where(overlap_for_each_prior < self.threshold,
                                 0, label_for_each_prior)
        matched_boxes = jnp.take_along_axis(
            boxes_xy, object_for_each_prior[..., None], axis=1)  # (N, P, 4)
        return true_classes, matched_boxes

    # ---- final reductions + hard-negative mining ---------------------------
    def _reduce(self, conf_all, loc_l1, true_classes):
        N, P = conf_all.shape
        positive = true_classes != 0
        n_pos = jnp.sum(positive, axis=1)                     # (N,)
        n_pos_total = jnp.sum(n_pos).astype(jnp.float32)

        # nn.L1Loss() = mean over (n_pos_total, 4) selected elements
        loc_loss = jnp.sum(loc_l1) / (n_pos_total * 4.0)

        conf_pos_sum = jnp.sum(jnp.where(positive, conf_all, 0.0))
        conf_neg = jnp.where(positive, 0.0, conf_all)
        # TODO(synk): descending per-row sort for hard-negative mining stays in
        # XLA — sorting has no clean Pallas/TPU kernel equivalent.
        conf_neg_sorted = jnp.flip(jnp.sort(conf_neg, axis=1), axis=1)
        ranks = jnp.arange(P)[None, :]
        n_hard_neg = (self.neg_pos_ratio * n_pos)[:, None]
        hard = ranks < n_hard_neg
        conf_hard_neg_sum = jnp.sum(jnp.where(hard, conf_neg_sorted, 0.0))

        conf_loss = (conf_hard_neg_sum + conf_pos_sum) / n_pos_total
        return conf_loss + self.alpha * loc_loss

    # ---- Pallas forward -----------------------------------------------------
    def __call__(self, predicted_locs, predicted_scores,
                 boxes_xy, labels, obj_valid):
        overlap = jaccard_overlap_pallas(boxes_xy, self.priors_xy_t)
        true_classes, matched_boxes = self._match(
            overlap, boxes_xy, labels, obj_valid)

        scores_t = jnp.transpose(predicted_scores, (0, 2, 1))    # (N, C, P)
        pred_locs_t = jnp.transpose(predicted_locs, (0, 2, 1))   # (N, 4, P)
        matched_t = jnp.transpose(matched_boxes, (0, 2, 1))      # (N, 4, P)

        conf_all, loc_l1 = loss_terms_pallas(
            scores_t, true_classes, pred_locs_t, matched_t, self.priors_cxcy_t)
        return self._reduce(conf_all, loc_l1, true_classes)

    # ---- pure-JAX reference (no Pallas) for correctness checking ------------
    def reference(self, predicted_locs, predicted_scores,
                  boxes_xy, labels, obj_valid):
        b = boxes_xy[:, :, None, :]                              # (N, M, 1, 4)
        p = self.priors_xy[None, None, :, :]                     # (1, 1, P, 4)
        iw = jnp.maximum(jnp.minimum(b[..., 2], p[..., 2])
                         - jnp.maximum(b[..., 0], p[..., 0]), 0.0)
        ih = jnp.maximum(jnp.minimum(b[..., 3], p[..., 3])
                         - jnp.maximum(b[..., 1], p[..., 1]), 0.0)
        inter = iw * ih
        area_b = (b[..., 2] - b[..., 0]) * (b[..., 3] - b[..., 1])
        area_p = (p[..., 2] - p[..., 0]) * (p[..., 3] - p[..., 1])
        overlap = inter / (area_b + area_p - inter)              # (N, M, P)

        true_classes, matched_boxes = self._match(
            overlap, boxes_xy, labels, obj_valid)

        logits = predicted_scores                                # (N, P, C)
        m = jnp.max(logits, axis=-1, keepdims=True)
        lse = m[..., 0] + jnp.log(jnp.sum(jnp.exp(logits - m), axis=-1))
        true_score = jnp.take_along_axis(
            logits, true_classes[..., None], axis=-1)[..., 0]
        conf_all = lse - true_score                              # (N, P)

        xy = matched_boxes                                       # (N, P, 4)
        cxcy = jnp.concatenate([(xy[..., :2] + xy[..., 2:]) / 2.0,
                                xy[..., 2:] - xy[..., :2]], axis=-1)
        pr = self.priors_cxcy[None]
        g = jnp.concatenate(
            [(cxcy[..., :2] - pr[..., :2]) / (pr[..., 2:] / 10.0),
             jnp.log(cxcy[..., 2:] / pr[..., 2:]) * 5.0], axis=-1)
        positive = true_classes != 0
        loc_l1 = jnp.where(positive,
                           jnp.sum(jnp.abs(predicted_locs - g), axis=-1), 0.0)

        return self._reduce(conf_all, loc_l1, true_classes)


if __name__ == "__main__":
    key = jax.random.PRNGKey(0)
    N = 2       # batch
    P = 1024    # priors (multiple of 128 for lane-dense tiles)
    C = 8       # classes (incl. background = 0)
    M = 8       # max objects per image (padded)

    k_prior, k_loc, k_score, k_box, k_lab = jax.random.split(key, 5)

    # synthetic priors in cxcy
    centers = jax.random.uniform(k_prior, (P, 2), jnp.float32, 0.05, 0.95)
    sizes = jax.random.uniform(jax.random.fold_in(k_prior, 1), (P, 2),
                               jnp.float32, 0.05, 0.4)
    priors_cxcy = jnp.concatenate([centers, sizes], axis=1)

    predicted_locs = jax.random.normal(k_loc, (N, P, 4), jnp.float32)
    predicted_scores = jax.random.normal(k_score, (N, P, C), jnp.float32)

    # ground-truth boxes padded to M per image + validity mask
    n_objects = jnp.array([3, 5], dtype=jnp.int32)
    xy1 = jax.random.uniform(k_box, (N, M, 2), jnp.float32, 0.0, 0.55)
    wh = jax.random.uniform(jax.random.fold_in(k_box, 1), (N, M, 2),
                            jnp.float32, 0.1, 0.4)
    boxes_xy = jnp.concatenate([xy1, xy1 + wh], axis=-1)
    labels = jax.random.randint(k_lab, (N, M), 1, C)
    obj_valid = jnp.arange(M)[None, :] < n_objects[:, None]
    boxes_xy = jnp.where(obj_valid[..., None], boxes_xy, 0.0)
    labels = jnp.where(obj_valid, labels, 0).astype(jnp.int32)

    crit = MultiBoxLossPallas(priors_cxcy, threshold=0.5,
                              neg_pos_ratio=3, alpha=1.0)

    loss = crit(predicted_locs, predicted_scores, boxes_xy, labels, obj_valid)
    loss = jax.block_until_ready(loss)

    loss_ref = crit.reference(predicted_locs, predicted_scores,
                              boxes_xy, labels, obj_valid)
    loss_ref = jax.block_until_ready(loss_ref)

    assert loss.shape == ()
    assert bool(jnp.isfinite(loss)), loss
    assert jnp.allclose(loss, loss_ref, atol=1e-4, rtol=1e-4), (loss, loss_ref)

    print("KERNEL_OK")
</pallas_src>

<mosaic_0001>
module attributes {stable_mosaic.version = 11 : i64} {
  func.func @_iou_kernel(%arg0: i32, %arg1: i32, %arg2: memref<1x8x4xf32, #tpu.memory_space<vmem>>, %arg3: memref<4x512xf32, #tpu.memory_space<vmem>>, %arg4: memref<1x8x512xf32, #tpu.memory_space<vmem>>) attributes {dimension_semantics = [#tpu.dimension_semantics<parallel>, #tpu.dimension_semantics<parallel>], iteration_bounds = array<i64: 2, 2>, scalar_prefetch = 0 : i64, scratch_operands = 0 : i64, tpu.core_type = #tpu.core_type<tc>, window_params = [{transform_indices = @transform_0, window_bounds = array<i64: 1, 8, 4>}, {transform_indices = @transform_1, window_bounds = array<i64: 4, 512>}, {transform_indices = @transform_2, window_bounds = array<i64: 1, 8, 512>}]} {
    %c0 = arith.constant 0 : index
    %c0_0 = arith.constant 0 : index
    %c0_1 = arith.constant 0 : index
    %0 = vector.load %arg2[%c0, %c0_0, %c0_1] : memref<1x8x4xf32, #tpu.memory_space<vmem>>, vector<1x8x4xf32>
    %1 = vector.shape_cast %0 : vector<1x8x4xf32> to vector<8x4xf32>
    %2 = vector.extract_strided_slice %1 {offsets = [0, 0], sizes = [8, 1], strides = [1, 1]} : vector<8x4xf32> to vector<8x1xf32>
    %3 = vector.extract_strided_slice %1 {offsets = [0, 1], sizes = [8, 1], strides = [1, 1]} : vector<8x4xf32> to vector<8x1xf32>
    %4 = vector.extract_strided_slice %1 {offsets = [0, 2], sizes = [8, 1], strides = [1, 1]} : vector<8x4xf32> to vector<8x1xf32>
    %5 = vector.extract_strided_slice %1 {offsets = [0, 3], sizes = [8, 1], strides = [1, 1]} : vector<8x4xf32> to vector<8x1xf32>
    %c0_2 = arith.constant 0 : index
    %c0_3 = arith.constant 0 : index
    %6 = vector.load %arg3[%c0_2, %c0_3] : memref<4x512xf32, #tpu.memory_space<vmem>>, vector<1x512xf32>
    %c1 = arith.constant 1 : index
    %c0_4 = arith.constant 0 : index
    %7 = vector.load %arg3[%c1, %c0_4] : memref<4x512xf32, #tpu.memory_space<vmem>>, vector<1x512xf32>
    %c2 = arith.constant 2 : index
    %c0_5 = arith.constant 0 : index
    %8 = vector.load %arg3[%c2, %c0_5] : memref<4x512xf32, #tpu.memory_space<vmem>>, vector<1x512xf32>
    %c3 = arith.constant 3 : index
    %c0_6 = arith.constant 0 : index
    %9 = vector.load %arg3[%c3, %c0_6] : memref<4x512xf32, #tpu.memory_space<vmem>>, vector<1x512xf32>
    %10 = vector.broadcast %4 : vector<8x1xf32> to vector<8x512xf32>
    %11 = vector.broadcast %8 : vector<1x512xf32> to vector<8x512xf32>
    %12 = arith.minimumf %10, %11 : vector<8x512xf32>
    %13 = vector.broadcast %2 : vector<8x1xf32> to vector<8x512xf32>
    %14 = vector.broadcast %6 : vector<1x512xf32> to vector<8x512xf32>
    %15 = arith.maximumf %13, %14 : vector<8x512xf32>
    %16 = arith.subf %12, %15 : vector<8x512xf32>
    %cst = arith.constant 0.000000e+00 : f32
    %17 = vector.broadcast %cst : f32 to vector<8x512xf32>
    %18 = arith.maximumf %16, %17 : vector<8x512xf32>
    %19 = vector.broadcast %5 : vector<8x1xf32> to vector<8x512xf32>
    %20 = vector.broadcast %9 : vector<1x512xf32> to vector<8x512xf32>
    %21 = arith.minimumf %19, %20 : vector<8x512xf32>
    %22 = vector.broadcast %3 : vector<8x1xf32> to vector<8x512xf32>
    %23 = vector.broadcast %7 : vector<1x512xf32> to vector<8x512xf32>
    %24 = arith.maximumf %22, %23 : vector<8x512xf32>
    %25 = arith.subf %21, %24 : vector<8x512xf32>
    %cst_7 = arith.constant 0.000000e+00 : f32
    %26 = vector.broadcast %cst_7 : f32 to vector<8x512xf32>
    %27 = arith.maximumf %25, %26 : vector<8x512xf32>
    %28 = arith.mulf %18, %27 : vector<8x512xf32>
    %29 = arith.subf %4, %2 : vector<8x1xf32>
    %30 = arith.subf %5, %3 : vector<8x1xf32>
    %31 = arith.mulf %29, %30 : vector<8x1xf32>
    %32 = arith.subf %8, %6 : vector<1x512xf32>
    %33 = arith.subf %9, %7 : vector<1x512xf32>
    %34 = arith.mulf %32, %33 : vector<1x512xf32>
    %35 = vector.broadcast %31 : vector<8x1xf32> to vector<8x512xf32>
    %36 = vector.broadcast %34 : vector<1x512xf32> to vector<8x512xf32>
    %37 = arith.addf %35, %36 : vector<8x512xf32>
    %38 = arith.subf %37, %28 : vector<8x512xf32>
    %39 = arith.divf %28, %38 : vector<8x512xf32>
    %c0_8 = arith.constant 0 : index
    %c0_9 = arith.constant 0 : index
    %c0_10 = arith.constant 0 : index
    %40 = vector.load %arg4[%c0_8, %c0_9, %c0_10] : memref<1x8x512xf32, #tpu.memory_space<vmem>>, vector<1x8x512xf32>
    %41 = vector.shape_cast %40 : vector<1x8x512xf32> to vector<8x512xf32>
    %42 = vector.shape_cast %39 : vector<8x512xf32> to vector<1x8x512xf32>
    tpu.vector_store %arg4[%c0_8, %c0_9, %c0_10], %42 {strides = array<i32>} : memref<1x8x512xf32, #tpu.memory_space<vmem>>, vector<1x8x512xf32>,
    return
  }
  func.func @transform_0(%arg0: i32, %arg1: i32) -> (i32, i32, i32) {
    %c0_i32 = arith.constant 0 : i32
    %c0_i32_0 = arith.constant 0 : i32
    %c0_i32_1 = arith.constant 0 : i32
    return %arg0, %c0_i32, %c0_i32_0 : i32, i32, i32
  }
  func.func @transform_1(%arg0: i32, %arg1: i32) -> (i32, i32) {
    %c0_i32 = arith.constant 0 : i32
    %c0_i32_0 = arith.constant 0 : i32
    return %c0_i32, %arg1 : i32, i32
  }
  func.func @transform_2(%arg0: i32, %arg1: i32) -> (i32, i32, i32) {
    %c0_i32 = arith.constant 0 : i32
    %c0_i32_0 = arith.constant 0 : i32
    return %arg0, %c0_i32, %arg1 : i32, i32, i32
  }
}

</mosaic_0001>

<bundles_post_ra>
// kernel: tpu_custom_call.1
= control target key start
LH: loop header
LB: loop body
LE: loop exit
PB: predicated region body
PF: predicated region fallthrough
CT: control target
= control target key end

     0   :  { %7 = vsyncpa [#allocation3], 0  ;;  %s1050_s0 = inlined_call_operand.vmem [shape: f32[2,8,4], index: 0, kind: input, shape index: {}]   ;;  %s1051_s1 = inlined_call_operand.hbm [shape: f32[4,1024], index: 1, kind: input, shape index: {}]   ;;  %s1052_s2 = inlined_call_operand.hbm [shape: f32[2,8,1024], index: 2, kind: output, shape index: {}]  }
   0x1   :  { %9 = vsyncpa [#allocation3 + $0x1], 0 }
   0x2   :  { %10 = vsyncpa [#allocation4], 0 }
   0x3   :  { %12 = vsyncpa [#allocation4 + $0x1], 0  ;;  %s822_s9 = smov 0   ;;  %s824_s10 = smov 0  }
   0x4   :  { %s826_s11 = smov 0   ;;  %s828_s12 = smov 0  }
   0x5   :  { %s830_s13 = smov 0   ;;  %s832_s14 = smov 0  }
   0x6   :  { %s834_s15 = smov 0   ;;  %s836_s16 = smov 0  }
   0x7   :  { %s838_s17 = smov 0   ;;  %s840_s18 = smov 0  }
   0x8   :  { %s842_s19 = smov 0  }
   0x9 LB: > { %1056 = sst [smem:[#allocation8_spill]] %s795_s18  ;;  %s505_s20 = sadd.s32 4294967295, %s799_s19   ;;  %s799_s19 = sphi %s842_s19, %s18_s19   ;;  %s795_s18 = sphi %s840_s18, %s1069_s18   ;;  %s791_s17 = sphi %s838_s17, %s1077_s17   ;;  %s787_s16 = sphi %s836_s16, %s1067_s16   ;;  %s783_s15 = sphi %s834_s15, %s1076_s15   ;;  %s779_s14 = sphi %s832_s14, %s1075_s14   ;;  %s775_s13 = sphi %s830_s13, %s1074_s13   ;;  %s771_s12 = sphi %s828_s12, %s1073_s12   ;;  %s767_s11 = sphi %s826_s11, %s1072_s11   ;;  %s763_s10 = sphi %s824_s10, %s1071_s10   ;;  %s759_s9 = sphi %s822_s9, %s1070_s9  }
   0xa   : > { %s506_s21 = sadd.s32 4294967294, %s799_s19   ;;  %s27_s22 = sadd.s32 1, %s791_s17 }
   0xb   : > { %s30_s23 = sadd.s32 1, %s795_s18  ;;  %p28_p0 = scmp.ge.s32.totalorder %s27_s22, 2 }
   0xc   : > { %s63_s24 = sadd.s32 1, %s779_s14  ;;  %p70_p1 = scmp.ne.s32.totalorder %s779_s14, %s775_s13 }
   0xd   : > { %p71_p2 = scmp.eq.s32.totalorder %s799_s19, 0  ;;  %s1079_s22 = smov (%p28_p0, %s27_s22), 0 }
   0xe   : > { %1057 = sst [smem:[#allocation9_spill]] %s1079_s22  ;;  %s1081_s23 = smov (!%p28_p0, %s30_s23), %s795_s18 }
   0xf   : > { %s60_s25 = ssub.s32 %s791_s17, %s1079_s22  ;;  %p888_p3 = por %p71_p2, %p70_p1 }
  0x10   : > { %p32_p4 = scmp.ge.s32.totalorder %s1081_s23, 2  ;;  %p61_p5 = scmp.eq.s32.totalorder %s60_s25, 0 }
  0x11   : > { %p76_p6 = scmp.ne.s32.totalorder %s775_s13, %s771_s12  ;;  %p77_p7 = scmp.eq.s32.totalorder %s505_s20, 0 }
  0x12   : > { %s1083_s23 = smov (%p32_p4, %s1081_s23), 0  ;;  %s91_s3 = sadd.s32 1, %s767_s11 }
  0x13   : > { %1059 = sst [smem:[#allocation10_spill]] %s1083_s23  ;;  %p898_p8 = por %p77_p7, %p76_p6 }
  0x14   : > { %s896_s27 = scalar_select %p61_p5, %s779_s14, %s63_s24  }
  0x15   : > { %s86_s29 = ssub.s32 %s795_s18, %s1083_s23  ;;  %p101_p10 = scmp.ne.s32.totalorder %s767_s11, %s763_s10 }
  0x16   : > { %s88_s30 = sor.u32 %s86_s29, %s60_s25  ;;  %p102_p11 = scmp.eq.s32.totalorder %s505_s20, 3 }
  0x17   : > { %p89_p9 = scmp.eq.s32.totalorder %s88_s30, 0  ;;  %p107_p12 = scmp.ne.s32.totalorder %s763_s10, %s759_s9 }
  0x18   : > { %p912_p13 = por %p102_p11, %p101_p10  ;;  %p108_p0 = scmp.eq.s32.totalorder %s506_s21, 3 }
  0x19   : > { %s910_s4 = scalar_select %p89_p9, %s767_s11, %s91_s3  }
  0x1a   : > { %p538_p1 = scmp.lt.s32.totalorder %s799_s19, 4  ;;  %p917_p2 = por %p108_p0, %p107_p12 }
  0x1b   : > { %s135_s7 = sand.u32 1, %s779_s14   ;;  %s525_s12 = sshll.u32 %s791_s17, 4 }
  0x1c   : > { %s509_s8 = sshll.u32 %s135_s7, 4  ;;  %s144_s25 = scalar_lea.hbm %s1051_s1, %s525_s12 }
  0x1d   : > { %s139_s29 = scalar_lea.vmem [#allocation2], %s509_s8  ;;  %s146_s3 = sshll.u32 %s144_s25, 4  ;;  %s147_s3 = int_to_ptr.hbm [resolvable:$true] %s146_s3 }
  0x1e   : > { %s148_s30 = sshll.u32 %s139_s29, 4  ;;  %p531_p4 = pnand %p538_p1, %p888_p3  ;;  %s149_s30 = int_to_ptr.vmem [resolvable:$true] %s148_s30 }
  0x1f   : > { %p512_p5 = scmp.ge.s32.totalorder %s799_s19, 1  ;;  %p153_p6 = scmp.lt.s32.totalorder %s799_s19, 5 }
  0x20   : > { %s136_s21 = scalar_lea.sflag [#allocation3], %s135_s7 }
  0x21   : > { %533 = dma.hbm_to_vmem [thread:$0]  (!%p531_p4), %s147_s3, 256, %s149_s30, %s136_s21  }
  0x22   : > { %p154_p7 = pnand %p512_p5, %p153_p6 }
  0x23   : > { %s159_s23 = sand.u32 (!%p154_p7), 1, %s775_s13  }
  0x24   : > { %157 = sbr.rel (%p154_p7) target bundleno = 427 (0x1ab), region = 28  ;;  %s513_s22 = sshll.u32 (!%p154_p7), %s159_s23, 4 }
  0x25   : > { %s160_s18 = scalar_lea.sflag (!%p154_p7), [#allocation3], %s159_s23  ;;  %s931_s20 = scalar_lea.vmem (!%p154_p7), [#allocation2], %s513_s22 }
  0x29   : > { %750 = dma.done.wait (%p898_p8), %s160_s18, 256  }
  0x2a   : > { %752 = vsyncadd (%p898_p8), %s160_s18, 4294967040  ;;  %p189_p3 = scmp.lt.s32.totalorder %s787_s16, 1  ;;  %s801_s25 = smov 2   ;;  %v802_v1 = vmov 2   ;;  %v803_v2 = vmov 0   ;;  %v805_v5 = vmov 3  }
  0x2b   : > { %634 = vset.pattern.permute.xlu1 %v802_v1  ;;  %638 = vset.pattern.permute.xlu0 %v802_v1  ;;  %s804_s18 = smov 127   ;;  %v806_v6 = vmov 1   ;;  %v517_v11 = vld [vmem:[%s931_s20 + $0x2] ss:$4 sm:$0xf]  ;;  %s520_s22 = sshll.u32 %s783_s15, 2 }
  0x2c   : > { %s190_s26 = scalar_select %p189_p3, %s787_s16, 1  ;;  %636 = vset.pattern.permute.xlu2 %v805_v5  ;;  %v196_v12 = vld [vmem:[%s931_s20] ss:$4 sm:$0xf]  ;;  %v209_v14 = vperm.slane %v517_v11, 0  ;;  %v210_v16 = vperm.slane %v517_v11, 1 }
  0x2d   : > { %v518_v13 = vld [vmem:[%s931_s20 + $0x3] ss:$4 sm:$0xf]  ;;  %v516_v15 = vld [vmem:[%s931_s20 + $0x1] ss:$4 sm:$0xf]  ;;  %v301_v45 = vsub.f32 %v517_v11, %v196_v12 }
  0x2e   : > { %s515_s7 = sshll.u32 %s190_s26, 3  ;;  %v211_v17 = vperm.slane %v517_v11, 2  ;;  %v226_v18 = vperm.slane %v196_v12, 0  ;;  %v251_v19 = vperm.slane %v518_v13, 0  ;;  %v252_v20 = vperm.slane %v518_v13, 1  ;;  %s521_s23 = sshll.u32 %s787_s16, 3 }
  0x2f   : > { %s192_s24 = scalar_lea.vmem %s1050_s0, %s515_s7  ;;  %v227_v21 = vperm.slane %v196_v12, 1  ;;  %v228_v22 = vperm.slane %v196_v12, 2  ;;  %v253_v24 = vperm.slane %v518_v13, 2  ;;  %v268_v25 = vperm.slane %v516_v15, 0  ;;  %s186_s28 = sand.u32 1, %s763_s10  }
  0x30   : > { %v195_v0 = vld [vmem:[%s192_s24] sm:$0xff]  ;;  %v269_v26 = vperm.slane %v516_v15, 1  ;;  %v270_v27 = vperm.slane %v516_v15, 2  ;;  %v254_v28 = vperm.slane %v518_v13, 3  ;;  %v212_v29 = vperm.slane %v517_v11, 3  ;;  %s968_s29 = sadd.s32 %s521_s23, %s520_s22  ;;  %s977_s15 = sshll.u32 %s186_s28, 5 }
  0x31   : > { %292 = vrot.lane.b32.xlu0 %v195_v0, %s801_s25  ;;  %205 = vperm.xlu1 %634, %v195_v0   ;;  %v271_v31 = vperm.slane %v516_v15, 3  ;;  %v229_v35 = vperm.slane %v196_v12, 3  ;;  %v302_v46 = vsub.f32 %v518_v13, %v516_v15  ;;  %s522_s16 = sshll.u32 %s968_s29, 3  ;;  %s188_s20 = scalar_lea.vmem [#allocation5], %s977_s15 }
  0x32   : > { %247 = vperm.xlu2 %636, %v195_v0   ;;  %s404_s21 = scalar_lea.hbm %s1052_s2, %s522_s16  ;;  %s406_s26 = sshll.u32 %s188_s20, 4  ;;  %s407_s26 = int_to_ptr.vmem [resolvable:$true] %s406_s26 }
  0x33   : > { %v303_v57 = vmul.f32 %v302_v46, %v301_v45  ;;  %s408_s7 = sshll.u32 %s404_s21, 4  ;;  %s391_s8 = scalar_lea.sflag [#allocation4], %s186_s28  ;;  %s409_s7 = int_to_ptr.hbm [resolvable:$true] %s408_s7 }
  0x34   : > { %s691_s12 = sshra.s32 %s409_s7, 4  ;;  %s697_s22 = scalar_lea.hbm %s1052_s2, 128  ;;  %s692_s12 = int_to_ptr.hbm [resolvable:$true] %s691_s12 }
  0x35   : > { %v313_v5 = vperm.slane %v303_v57, 3  ;;  %s693_s24 = scalar_lea.hbm %s692_s12, 32  ;;  %p698_p11 = scmp.lt.s32.totalorder %s692_s12, %s1052_s2 }
  0x36   : > { %p694_p8 = scmp.ne.s32.totalorder %s692_s12, %s693_s24  ;;  %p699_p12 = scmp.lt.s32.totalorder %s697_s22, %s693_s24 }
  0x38   : > { %p695_p9 = pnand %p694_p8, %p912_p13  ;;  %p700_p0 = por %p699_p12, %p698_p11 }
  0x39   : > { %635 = vset.pattern.permute.xlu1 %v803_v2  ;;  %v310_v2 = vperm.slane %v303_v57, 0 }
  0x3a   : > { %222 = vperm.xlu1 %635, %v195_v0   ;;  %637 = vset.pattern.permute.xlu2 %v806_v6  ;;  %p696_p10 = pneg %p695_p9 }
  0x3b   : > { %264 = vperm.xlu2 %637, %v195_v0  }
  0x3c   : > { %p701_p1 = pnand %p700_p0, %p696_p10 }
  0x8c   : > { %v248_v10 = vpop.permute.xlu2 %247 }
  0x8d   : > { %v259_v37 = vmin.f32 %v248_v10, %v251_v19  ;;  %v260_v38 = vmin.f32 %v248_v10, %v252_v20  ;;  %v261_v41 = vmin.f32 %v248_v10, %v253_v24  ;;  %v262_v49 = vmin.f32 %v248_v10, %v254_v28 }
  0x95   : > { %v265_v32 = vpop.permute.xlu2 %264 }
  0x96   : > { %v276_v42 = vmax.f32 %v265_v32, %v268_v25  ;;  %v277_v43 = vmax.f32 %v265_v32, %v269_v26  ;;  %v278_v44 = vmax.f32 %v265_v32, %v270_v27  ;;  %v279_v50 = vmax.f32 %v265_v32, %v271_v31 }
  0x98   : > { %v280_v53 = vsub.f32 %v259_v37, %v276_v42  ;;  %v281_v54 = vsub.f32 %v260_v38, %v277_v43  ;;  %v282_v55 = vsub.f32 %v261_v41, %v278_v44  ;;  %v283_v58 = vsub.f32 %v262_v49, %v279_v50 }
  0x9a   : > { %v284_v62 = vmax.f32 %v280_v53, 0.0  ;;  %v285_v63 = vmax.f32 %v281_v54, 0.0  ;;  %v287_v6 = vmax.f32 %v283_v58, 0.0 }
  0xa3   : > { %v293_v3 = vpop.permute.xlu0 %292  ;;  %v206_v9 = vpop.permute.xlu1 %205 }
  0xa4   : > { %v295_v4 = vsub.f32 %v195_v0, %v293_v3  ;;  %v217_v30 = vmin.f32 %v206_v9, %v209_v14  ;;  %v218_v33 = vmin.f32 %v206_v9, %v210_v16  ;;  %v219_v34 = vmin.f32 %v206_v9, %v211_v17 }
  0xa5   : > { %v220_v47 = vmin.f32 %v206_v9, %v212_v29  ;;  %v286_v0 = vmax.f32 %v282_v55, 0.0  ;;  %v311_v3 = vperm.slane %v303_v57, 1 }
  0xa6   : > { %297 = vrot.lane.b32.xlu0 %v295_v4, %s804_s18 }
  0xac   : > { %v223_v23 = vpop.permute.xlu1 %222 }
  0xad   : > { %v234_v36 = vmax.f32 %v223_v23, %v226_v18  ;;  %v235_v39 = vmax.f32 %v223_v23, %v227_v21  ;;  %v236_v40 = vmax.f32 %v223_v23, %v228_v22  ;;  %v237_v48 = vmax.f32 %v223_v23, %v229_v35 }
  0xaf   : > { %v238_v51 = vsub.f32 %v217_v30, %v234_v36  ;;  %v239_v52 = vsub.f32 %v218_v33, %v235_v39  ;;  %v240_v56 = vsub.f32 %v219_v34, %v236_v40  ;;  %v241_v59 = vsub.f32 %v220_v47, %v237_v48 }
  0xb1   : > { %v242_v60 = vmax.f32 %v238_v51, 0.0  ;;  %v243_v61 = vmax.f32 %v239_v52, 0.0  ;;  %v244_v1 = vmax.f32 %v240_v56, 0.0 }
  0xb3   : > { %v948_v9 = vmul.f32 %v285_v63, %v243_v61  ;;  %v950_v10 = vmul.f32 %v286_v0, %v244_v1 }
 0x118   : > { %v298_v7 = vpop.permute.xlu0 %297 }
 0x119   : > { %v300_v8 = vmul.f32 %v298_v7, %v295_v4  ;;  %v312_v4 = vperm.slane %v303_v57, 2  ;;  %v245_v7 = vmax.f32 %v241_v59, 0.0 }
 0x11b   : > { %306 = vperm.xlu0 %638, %v300_v8   ;;  %v946_v8 = vmul.f32 %v284_v62, %v242_v60  ;;  %v952_v16 = vmul.f32 %v287_v6, %v245_v7 }
 0x18d   : > { %v307_v11 = vpop.permute.xlu0 %306 }
 0x18e   : > { %v318_v12 = vadd.f32 %v310_v2, %v307_v11  ;;  %v319_v13 = vadd.f32 %v311_v3, %v307_v11  ;;  %v320_v14 = vadd.f32 %v312_v4, %v307_v11  ;;  %v321_v15 = vadd.f32 %v313_v5, %v307_v11 }
 0x190   : > { %v322_v17 = vsub.f32 %v318_v12, %v946_v8  ;;  %v323_v18 = vsub.f32 %v319_v13, %v948_v9  ;;  %v324_v19 = vsub.f32 %v320_v14, %v950_v10  ;;  %v958_v20 = vsub.f32 %v321_v15, %v952_v16 }
 0x192   : > { %639 = vrcp.f32 %v322_v17  ;;  %v335_v21 = vand.u32 2147483647, %v322_v17  ;;  %v337_v22 = vand.u32 2147483648, %v322_v17  ;;  %v350_v24 = vand.u32 2147483647, %v323_v18 }
 0x193   : > { %641 = vrcp.f32 %v323_v18  ;;  %v352_v25 = vand.u32 2147483648, %v323_v18  ;;  %vm331_vm0 = vweird.f32 %v322_v17  ;;  %vm346_vm1 = vweird.f32 %v323_v18 }
 0x194   : > { %643 = vrcp.f32 %v324_v19  ;;  %vm964_vm2 = vcmp.eq.f32.partialorder %v335_v21, 8.507059e+37  ;;  %v338_v32 = vor.u32 1.1754944e-38, %v337_v22  ;;  %vm970_vm3 = vcmp.eq.f32.partialorder %v350_v24, 8.507059e+37 }
 0x195   : > { %645 = vrcp.f32 %v958_v20  ;;  %v353_v37 = vor.u32 1.1754944e-38, %v352_v25  ;;  %vm361_vm4 = vweird.f32 %v324_v19  ;;  %v365_v42 = vand.u32 2147483647, %v324_v19 }
 0x196   : > { %v367_v43 = vand.u32 2147483648, %v324_v19  ;;  %vm376_vm9 = vweird.f32 %v958_v20  ;;  %v380_v48 = vand.u32 2147483647, %v958_v20  ;;  %v382_v49 = vand.u32 2147483648, %v958_v20 }
 0x197   : > { %vm366_vm13 = vcmp.eq.f32.partialorder %v365_v42, 8.507059e+37 }
 0x198   : > { %v640_v23 = vpop.eup %639  ;;  %v368_v55 = vor.u32 1.1754944e-38, %v367_v43  ;;  %v383_v62 = vor.u32 1.1754944e-38, %v382_v49  ;;  %vm381_vm15 = vcmp.eq.f32.partialorder %v380_v48, 8.507059e+37 }
 0x199   : > { %v642_v26 = vpop.eup %641  ;;  %v327_v27 = vmul.f32 %v640_v23, %v322_v17  ;;  %vm332_vm5 = vweird.f32 %v640_v23 }
 0x19a   : > { %v644_v28 = vpop.eup %643  ;;  %v342_v29 = vmul.f32 %v642_v26, %v323_v18  ;;  %vm347_vm6 = vweird.f32 %v642_v26  ;;  %vm333_vm8 = vmor %vm331_vm0, %vm332_vm5 }
 0x19b   : > { %v328_v30 = vsub.f32 1.0, %v327_v27  ;;  %v357_v33 = vmul.f32 %v644_v28, %v324_v19  ;;  %v646_v34 = vpop.eup %645  ;;  %vm362_vm7 = vweird.f32 %v644_v28  ;;  %vm348_vm10 = vmor %vm346_vm1, %vm347_vm6 }
 0x19c   : > { %v343_v35 = vsub.f32 1.0, %v342_v29  ;;  %v372_v40 = vmul.f32 %v646_v34, %v958_v20  ;;  %vm377_vm11 = vweird.f32 %v646_v34  ;;  %vm363_vm12 = vmor %vm361_vm4, %vm362_vm7 }
 0x19d   : > { %v329_v38 = vmul.f32 %v640_v23, %v328_v30  ;;  %v358_v39 = vsub.f32 1.0, %v357_v33  ;;  %vm378_vm14 = vmor %vm376_vm9, %vm377_vm11 }
 0x19e   : > { %v344_v41 = vmul.f32 %v642_v26, %v343_v35  ;;  %v373_v46 = vsub.f32 1.0, %v372_v40 }
 0x19f   : > { %v330_v44 = vadd.f32 %v640_v23, %v329_v38  ;;  %v359_v45 = vmul.f32 %v644_v28, %v358_v39 }
 0x1a0   : > { %v345_v47 = vadd.f32 %v642_v26, %v344_v41  ;;  %v374_v52 = vmul.f32 %v646_v34, %v373_v46 }
 0x1a1   : > { %v334_v50 = vsel %vm333_vm8, %v640_v23, %v330_v44  ;;  %v360_v51 = vadd.f32 %v644_v28, %v359_v45 }
 0x1a2   : > { %v339_v53 = vsel %vm964_vm2, %v338_v32, %v334_v50  ;;  %v349_v54 = vsel %vm348_vm10, %v642_v26, %v345_v47  ;;  %v375_v59 = vadd.f32 %v646_v34, %v374_v52 }
 0x1a3   : > { %v340_v56 = vmul.f32 %v339_v53, %v946_v8  ;;  %v354_v57 = vsel %vm970_vm3, %v353_v37, %v349_v54  ;;  %v364_v58 = vsel %vm363_vm12, %v644_v28, %v360_v51 }
 0x1a4   : > { %v355_v60 = vmul.f32 %v354_v57, %v948_v9  ;;  %v369_v61 = vsel %vm366_vm13, %v368_v55, %v364_v58  ;;  %v379_v0 = vsel %vm378_vm14, %v646_v34, %v375_v59 }
 0x1a5   : > { %v370_v63 = vmul.f32 %v369_v61, %v950_v10  ;;  %386 = vst [vmem:[%s188_s20] sm:$0xff] %v340_v56  ;;  %v384_v1 = vsel %vm381_vm15, %v383_v62, %v379_v0 }
 0x1a6   : > { %387 = vst [vmem:[%s188_s20 + $0x8] sm:$0xff] %v355_v60  ;;  %v385_v2 = vmul.f32 %v384_v1, %v952_v16 }
 0x1a7   : > { %388 = vst [vmem:[%s188_s20 + $0x10] sm:$0xff] %v370_v63 }
 0x1a8   : > { %389 = vst [vmem:[%s188_s20 + $0x18] sm:$0xff] %v385_v2 }
 0x1a9   : > { %704 = shalt.err (!%p701_p1)
}
 0x1aa   : > { %528 = dma.vmem_to_hbm [thread:$0]  (%p912_p13), %s407_s26, 512, %s409_s7, %s391_s8  }
 0x1ab PF: > { %p539_p4 = scmp.ge.s32.totalorder %s799_s19, 2  ;;  %s420_s28 = sand.u32 1, %s759_s9  }
 0x1ac   : > { %s421_s15 = scalar_lea.sflag [#allocation4], %s420_s28 }
 0x1ad   : > { %p535_p5 = pnand %p539_p4, %p917_p2 }
 0x1af   : > { %p536_p6 = pneg %p535_p5 }
 0x1b1   : > { %754 = dma.done.wait (%p536_p6), %s421_s15, 512  }
 0x1b2   : > { %756 = vsyncadd (%p536_p6), %s421_s15, 4294966784  ;;  %s18_s19 = sadd.s32 1, %s799_s19   ;;  %s1067_s16 = sld [smem:[#allocation8_spill]] }
 0x1b3   : > { %p15_p7 = scmp.ge.s32.totalorder %s18_s19, 6   ;;  %s1068_s5 = sld [smem:[#allocation9_spill]] }
 0x1b4   : > { %s1069_s18 = sld [smem:[#allocation10_spill]]  ;;  %s1070_s9 = smov %s763_s10 }
 0x1b5   : > { %s1071_s10 = smov %s767_s11  ;;  %s1072_s11 = smov %s910_s4 }
 0x1b6   : > { %s1073_s12 = smov %s775_s13  ;;  %s1074_s13 = smov %s779_s14 }
 0x1b7   : > { %s1075_s14 = smov %s896_s27  ;;  %s1076_s15 = smov %s791_s17 }
 0x1b8   :  { %17 = sbr.rel (!%p15_p7) target bundleno = 9 (0x9), region = 79 }
 0x1b9   : > { %s1077_s17 = smov %s1068_s5 }
 0x1bd   :  { %427 = vsyncpa [#allocation3], 1 }
 0x1be   :  { %429 = vsyncpa [#allocation3 + $0x1], 1 }
 0x1bf   :  { %430 = vsyncpa [#allocation4], 1 }
 0x1c0   :  { %432 = vsyncpa [#allocation4 + $0x1], 1 }

</bundles_post_ra>
